<compile_context>
chip_gen: v7x
topology: tpu7x:2x2x1
jax: 0.10.0
libtpu: 0.0.40
codegen_flags: <defaults>
</compile_context>

<pallas_src>
import functools

import jax
import jax.numpy as jnp
from jax import lax
from jax.experimental import pallas as pl
from jax.experimental.pallas import tpu as pltpu


def _pick_tile(dim, target, align):
    """Largest tile <= target that divides dim and is align-aligned (or the full dim)."""
    if dim <= target:
        return dim
    t = (target // align) * align
    while t >= align:
        if dim % t == 0:
            return t
        t -= align
    return dim


# ----------------------------------------------------------------------------
# Tiled linear:  y = x @ W^T + b   (W passed as (Nout, K), contracted on last dim)
# ----------------------------------------------------------------------------
def _linear_kernel(x_ref, w_ref, b_ref, o_ref, acc_ref):
    k = pl.program_id(2)

    @pl.when(k == 0)
    def _():
        acc_ref[...] = jnp.zeros_like(acc_ref)

    acc_ref[...] += lax.dot_general(
        x_ref[...], w_ref[...],
        dimension_numbers=(((1,), (1,)), ((), ())),
        preferred_element_type=jnp.float32)

    @pl.when(k == pl.num_programs(2) - 1)
    def _():
        o_ref[...] = (acc_ref[...] + b_ref[...].astype(jnp.float32)).astype(o_ref.dtype)


def linear(x, w, b, *, tm=256, tn=256, tk=512):
    """x: (M, K), w: (Nout, K), b: (Nout,) -> (M, Nout)."""
    M, K = x.shape
    Nout = w.shape[0]
    tm = _pick_tile(M, tm, 8)
    tn = _pick_tile(Nout, tn, 128)
    tk = _pick_tile(K, tk, 128)
    grid = (M // tm, Nout // tn, K // tk)
    b2 = b.reshape(1, Nout)
    itemsize = x.dtype.itemsize
    cost = pl.CostEstimate(
        flops=2 * M * K * Nout,
        transcendentals=0,
        bytes_accessed=(M * K + Nout * K + Nout + M * Nout) * itemsize)
    return pl.pallas_call(
        _linear_kernel,
        out_shape=jax.ShapeDtypeStruct((M, Nout), x.dtype),
        grid_spec=pltpu.PrefetchScalarGridSpec(
            num_scalar_prefetch=0,
            grid=grid,
            in_specs=[
                pl.BlockSpec((tm, tk), lambda i, j, k: (i, k)),
                pl.BlockSpec((tn, tk), lambda i, j, k: (j, k)),
                pl.BlockSpec((1, tn), lambda i, j, k: (0, j)),
            ],
            out_specs=pl.BlockSpec((tm, tn), lambda i, j, k: (i, j)),
            scratch_shapes=[pltpu.VMEM((tm, tn), jnp.float32)],
        ),
        compiler_params=pltpu.CompilerParams(
            dimension_semantics=("parallel", "parallel", "arbitrary")),
        cost_estimate=cost,
    )(x, w, b2)


# ----------------------------------------------------------------------------
# Dual-input tiled linear:  y = x1 @ W1^T + x2 @ W2^T + b
# (replaces out_proj + concat + final Linear after the algebraic fold)
# ----------------------------------------------------------------------------
def _linear_dual_kernel(x1_ref, x2_ref, w1_ref, w2_ref, b_ref, o_ref, acc_ref):
    k = pl.program_id(2)
    dn = (((1,), (1,)), ((), ()))

    @pl.when(k == 0)
    def _():
        acc_ref[...] = jnp.zeros_like(acc_ref)

    acc_ref[...] += lax.dot_general(x1_ref[...], w1_ref[...], dimension_numbers=dn,
                                    preferred_element_type=jnp.float32)
    acc_ref[...] += lax.dot_general(x2_ref[...], w2_ref[...], dimension_numbers=dn,
                                    preferred_element_type=jnp.float32)

    @pl.when(k == pl.num_programs(2) - 1)
    def _():
        o_ref[...] = (acc_ref[...] + b_ref[...].astype(jnp.float32)).astype(o_ref.dtype)


def linear_dual(x1, x2, w1, w2, b, *, tm=256, tn=256, tk=512):
    """x1, x2: (M, K); w1, w2: (Nout, K); b: (Nout,) -> (M, Nout)."""
    M, K = x1.shape
    Nout = w1.shape[0]
    tm = _pick_tile(M, tm, 8)
    tn = _pick_tile(Nout, tn, 128)
    tk = _pick_tile(K, tk, 128)
    grid = (M // tm, Nout // tn, K // tk)
    b2 = b.reshape(1, Nout)
    itemsize = x1.dtype.itemsize
    cost = pl.CostEstimate(
        flops=4 * M * K * Nout,
        transcendentals=0,
        bytes_accessed=(2 * M * K + 2 * Nout * K + Nout + M * Nout) * itemsize)
    return pl.pallas_call(
        _linear_dual_kernel,
        out_shape=jax.ShapeDtypeStruct((M, Nout), x1.dtype),
        grid_spec=pltpu.PrefetchScalarGridSpec(
            num_scalar_prefetch=0,
            grid=grid,
            in_specs=[
                pl.BlockSpec((tm, tk), lambda i, j, k: (i, k)),
                pl.BlockSpec((tm, tk), lambda i, j, k: (i, k)),
                pl.BlockSpec((tn, tk), lambda i, j, k: (j, k)),
                pl.BlockSpec((tn, tk), lambda i, j, k: (j, k)),
                pl.BlockSpec((1, tn), lambda i, j, k: (0, j)),
            ],
            out_specs=pl.BlockSpec((tm, tn), lambda i, j, k: (i, j)),
            scratch_shapes=[pltpu.VMEM((tm, tn), jnp.float32)],
        ),
        compiler_params=pltpu.CompilerParams(
            dimension_semantics=("parallel", "parallel", "arbitrary")),
        cost_estimate=cost,
    )(x1, x2, w1, w2, b2)


# ----------------------------------------------------------------------------
# Attention: grid over batch; lane-dense blocks; heads looped inside the kernel;
# head-averaged attention weights accumulated in-kernel.
# ----------------------------------------------------------------------------
def _attn_kernel(q_ref, k_ref, v_ref, o_ref, w_ref, *, nhead, scale):
    q = q_ref[0].astype(jnp.float32)   # (L, E)
    k = k_ref[0].astype(jnp.float32)   # (S, E)
    v = v_ref[0]                       # (S, E)
    L, E = q.shape
    S = k.shape[0]
    dh = E // nhead
    dn = (((1,), (1,)), ((), ()))      # contract last dims (no explicit .T)

    w_acc = jnp.zeros((L, S), jnp.float32)
    o_parts = []
    for h in range(nhead):             # static unroll over heads
        lo, hi = h * dh, (h + 1) * dh
        s = lax.dot_general(q[:, lo:hi] * scale, k[:, lo:hi],
                            dimension_numbers=dn,
                            preferred_element_type=jnp.float32)       # (L, S)
        m = jnp.max(s, axis=-1, keepdims=True)
        e = jnp.exp(s - m)
        p = e * pl.reciprocal(jnp.sum(e, axis=-1, keepdims=True), approx=True)
        w_acc = w_acc + p * (1.0 / nhead)
        o_parts.append(jnp.dot(p.astype(v.dtype), v[:, lo:hi],
                               preferred_element_type=jnp.float32))   # (L, dh)
    # Single lane-dense (L, E) store instead of nhead sub-lane-width stores.
    o_ref[0] = jnp.concatenate(o_parts, axis=-1).astype(o_ref.dtype)
    w_ref[0] = w_acc


def attention_core(q, k, v, nhead, scale):
    """q: (N, L, E), k/v: (N, S, E) -> (out (N, L, E), avg weights (N, L, S))."""
    N, L, E = q.shape
    S = k.shape[1]
    itemsize = q.dtype.itemsize
    cost = pl.CostEstimate(
        flops=4 * N * L * S * E,
        transcendentals=N * nhead * L * S,
        bytes_accessed=(N * L * E + 2 * N * S * E + N * L * E) * itemsize + N * L * S * 4)
    return pl.pallas_call(
        functools.partial(_attn_kernel, nhead=nhead, scale=scale),
        out_shape=(
            jax.ShapeDtypeStruct((N, L, E), q.dtype),
            jax.ShapeDtypeStruct((N, L, S), jnp.float32),
        ),
        grid=(N,),
        in_specs=[
            pl.BlockSpec((1, L, E), lambda b: (b, 0, 0)),
            pl.BlockSpec((1, S, E), lambda b: (b, 0, 0)),
            pl.BlockSpec((1, S, E), lambda b: (b, 0, 0)),
        ],
        out_specs=(
            pl.BlockSpec((1, L, E), lambda b: (b, 0, 0)),
            pl.BlockSpec((1, L, S), lambda b: (b, 0, 0)),
        ),
        compiler_params=pltpu.CompilerParams(dimension_semantics=("parallel",)),
        cost_estimate=cost,
    )(q, k, v)


# ----------------------------------------------------------------------------
# Module forward
# ----------------------------------------------------------------------------
def multihead_attention_cat_forward(query, key, value, params, nhead):
    L, N, E = query.shape
    S = key.shape[0]
    Dh = E // nhead

    w_in = params["in_proj_weight"]    # (3E, E)
    b_in = params["in_proj_bias"]      # (3E,)
    w_out = params["out_proj_weight"]  # (E, E)
    b_out = params["out_proj_bias"]    # (E,)
    w_lin = params["linear_weight"]    # (E, 2E)
    b_lin = params["linear_bias"]      # (E,)

    # Batch-major layout so all attention blocks are lane-dense (full E lanes)
    # and the (L, BH, Dh) transposes / head reshapes disappear entirely.
    q_in = query.transpose(1, 0, 2).reshape(N * L, E)
    k_in = key.transpose(1, 0, 2).reshape(N * S, E)
    v_in = value.transpose(1, 0, 2).reshape(N * S, E)

    # Input projections (tiled MXU matmuls; no W^T materialization).
    q = linear(q_in, w_in[:E], b_in[:E]).reshape(N, L, E)
    k = linear(k_in, w_in[E:2 * E], b_in[E:2 * E]).reshape(N, S, E)
    v = linear(v_in, w_in[2 * E:], b_in[2 * E:]).reshape(N, S, E)

    scale = 1.0 / (Dh ** 0.5)
    attn_out, weights = attention_core(q, k, v, nhead, scale)  # (N,L,E), (N,L,S)

    # Fold out_proj into the first half of the final Linear:
    #   linear(cat([out_proj(attn), query])) =
    #     attn @ (W1 @ W_out)^T + query @ W2^T + (W1 @ b_out + b_lin)
    w1 = w_lin[:, :E]
    w2 = w_lin[:, E:]
    w1f = w1 @ w_out
    bf = w1 @ b_out + b_lin

    out_flat = linear_dual(attn_out.reshape(N * L, E), q_in, w1f, w2, bf)
    output = out_flat.reshape(N, L, E).transpose(1, 0, 2)      # back to (L, N, E)
    return output, weights


# ----------------------------------------------------------------------------
# Pure-JAX reference (for correctness check)
# ----------------------------------------------------------------------------
def reference_forward(query, key, value, params, nhead):
    L, N, E = query.shape
    S = key.shape[0]
    Dh = E // nhead
    w_in, b_in = params["in_proj_weight"], params["in_proj_bias"]
    q = query @ w_in[:E].T + b_in[:E]
    k = key @ w_in[E:2 * E].T + b_in[E:2 * E]
    v = value @ w_in[2 * E:].T + b_in[2 * E:]
    q = q.reshape(L, N * nhead, Dh).transpose(1, 0, 2) / (Dh ** 0.5)
    k = k.reshape(S, N * nhead, Dh).transpose(1, 0, 2)
    v = v.reshape(S, N * nhead, Dh).transpose(1, 0, 2)
    s = jnp.einsum("bld,bsd->bls", q, k)
    p = jax.nn.softmax(s, axis=-1)
    o = jnp.einsum("bls,bsd->bld", p, v)
    o = o.transpose(1, 0, 2).reshape(L * N, E)
    o = (o @ params["out_proj_weight"].T + params["out_proj_bias"]).reshape(L, N, E)
    w = p.reshape(N, nhead, L, S).mean(axis=1)
    cat = jnp.concatenate([o, query], axis=-1)
    out = cat @ params["linear_weight"].T + params["linear_bias"]
    return out, w


# ----------------------------------------------------------------------------
# Main
# ----------------------------------------------------------------------------
if __name__ == "__main__":
    d_model, nhead = 32, 4
    L, S, N = 8, 8, 2
    dtype = jnp.float32

    key0 = jax.random.PRNGKey(0)
    ks = jax.random.split(key0, 10)

    params = {
        "in_proj_weight": 0.1 * jax.random.normal(ks[0], (3 * d_model, d_model), dtype),
        "in_proj_bias":   0.1 * jax.random.normal(ks[1], (3 * d_model,), dtype),
        "out_proj_weight": 0.1 * jax.random.normal(ks[2], (d_model, d_model), dtype),
        "out_proj_bias":  0.1 * jax.random.normal(ks[3], (d_model,), dtype),
        "linear_weight":  0.1 * jax.random.normal(ks[4], (d_model, 2 * d_model), dtype),
        "linear_bias":    0.1 * jax.random.normal(ks[5], (d_model,), dtype),
    }

    query = jax.random.normal(ks[6], (L, N, d_model), dtype)
    key_in = jax.random.normal(ks[7], (S, N, d_model), dtype)
    value = jax.random.normal(ks[8], (S, N, d_model), dtype)

    out, weights = multihead_attention_cat_forward(query, key_in, value, params, nhead)
    out, weights = jax.block_until_ready((out, weights))

    ref_out, ref_w = reference_forward(query, key_in, value, params, nhead)
    assert out.shape == (L, N, d_model)
    assert weights.shape == (N, L, S)
    assert jnp.allclose(out, ref_out, rtol=2e-3, atol=2e-3)
    assert jnp.allclose(weights, ref_w, rtol=2e-3, atol=2e-3)

    print("KERNEL_OK")
</pallas_src>

<mosaic_0001>
module attributes {stable_mosaic.version = 11 : i64} {
  func.func @_linear_kernel(%arg0: i32, %arg1: i32, %arg2: i32, %arg3: memref<16x32xf32, #tpu.memory_space<vmem>>, %arg4: memref<32x32xf32, #tpu.memory_space<vmem>>, %arg5: memref<1x32xf32, #tpu.memory_space<vmem>>, %arg6: memref<16x32xf32, #tpu.memory_space<vmem>>, %arg7: memref<16x32xf32, #tpu.memory_space<vmem>>) attributes {dimension_semantics = [#tpu.dimension_semantics<parallel>, #tpu.dimension_semantics<parallel>, #tpu.dimension_semantics<arbitrary>], iteration_bounds = array<i64: 1, 1, 1>, scalar_prefetch = 0 : i64, scratch_operands = 1 : i64, tpu.core_type = #tpu.core_type<tc>, window_params = [{transform_indices = @transform_0, window_bounds = array<i64: 16, 32>}, {transform_indices = @transform_1, window_bounds = array<i64: 32, 32>}, {transform_indices = @transform_2, window_bounds = array<i64: 1, 32>}, {transform_indices = @transform_3, window_bounds = array<i64: 16, 32>}]} {
    %c0_i32 = arith.constant 0 : i32
    %0 = arith.cmpi eq, %arg2, %c0_i32 : i32
    %1 = arith.extui %0 : i1 to i32
    %c0_i32_0 = arith.constant 0 : i32
    %2 = arith.cmpi ne, %1, %c0_i32_0 : i32
    scf.if %2 {
      %cst_10 = arith.constant 0.000000e+00 : f32
      %12 = vector.broadcast %cst_10 : f32 to vector<16x32xf32>
      %c0_11 = arith.constant 0 : index
      %c0_12 = arith.constant 0 : index
      %13 = vector.load %arg7[%c0_11, %c0_12] : memref<16x32xf32, #tpu.memory_space<vmem>>, vector<16x32xf32>
      tpu.vector_store %arg7[%c0_11, %c0_12], %12 {strides = array<i32>} : memref<16x32xf32, #tpu.memory_space<vmem>>, vector<16x32xf32>,
    } else {
    }
    %c0 = arith.constant 0 : index
    %c0_1 = arith.constant 0 : index
    %3 = vector.load %arg7[%c0, %c0_1] : memref<16x32xf32, #tpu.memory_space<vmem>>, vector<16x32xf32>
    %c0_2 = arith.constant 0 : index
    %c0_3 = arith.constant 0 : index
    %4 = vector.load %arg3[%c0_2, %c0_3] : memref<16x32xf32, #tpu.memory_space<vmem>>, vector<16x32xf32>
    %c0_4 = arith.constant 0 : index
    %c0_5 = arith.constant 0 : index
    %5 = vector.load %arg4[%c0_4, %c0_5] : memref<32x32xf32, #tpu.memory_space<vmem>>, vector<32x32xf32>
    %cst = arith.constant dense<0.000000e+00> : vector<16x32xf32>
    %6 = tpu.matmul %4, %5, %cst {dimension_numbers = #tpu.dot_dimension_numbers<[1], [1], [0], [0], [0, 0, 1, 0], [], []>} : vector<16x32xf32>, vector<32x32xf32>, vector<16x32xf32> -> vector<16x32xf32>
    %7 = arith.addf %3, %6 : vector<16x32xf32>
    %c0_6 = arith.constant 0 : index
    %c0_7 = arith.constant 0 : index
    %8 = vector.load %arg7[%c0_6, %c0_7] : memref<16x32xf32, #tpu.memory_space<vmem>>, vector<16x32xf32>
    tpu.vector_store %arg7[%c0_6, %c0_7], %7 {strides = array<i32>} : memref<16x32xf32, #tpu.memory_space<vmem>>, vector<16x32xf32>,
    %c0_i32_8 = arith.constant 0 : i32
    %9 = arith.cmpi eq, %arg2, %c0_i32_8 : i32
    %10 = arith.extui %9 : i1 to i32
    %c0_i32_9 = arith.constant 0 : i32
    %11 = arith.cmpi ne, %10, %c0_i32_9 : i32
    scf.if %11 {
      %c0_10 = arith.constant 0 : index
      %c0_11 = arith.constant 0 : index
      %12 = vector.load %arg7[%c0_10, %c0_11] : memref<16x32xf32, #tpu.memory_space<vmem>>, vector<16x32xf32>
      %c0_12 = arith.constant 0 : index
      %c0_13 = arith.constant 0 : index
      %13 = vector.load %arg5[%c0_12, %c0_13] : memref<1x32xf32, #tpu.memory_space<vmem>>, vector<1x32xf32>
      %14 = vector.broadcast %13 : vector<1x32xf32> to vector<16x32xf32>
      %15 = arith.addf %12, %14 : vector<16x32xf32>
      %c0_14 = arith.constant 0 : index
      %c0_15 = arith.constant 0 : index
      %16 = vector.load %arg6[%c0_14, %c0_15] : memref<16x32xf32, #tpu.memory_space<vmem>>, vector<16x32xf32>
      tpu.vector_store %arg6[%c0_14, %c0_15], %15 {strides = array<i32>} : memref<16x32xf32, #tpu.memory_space<vmem>>, vector<16x32xf32>,
    } else {
    }
    return
  }
  func.func @transform_0(%arg0: i32, %arg1: i32, %arg2: i32) -> (i32, i32) {
    %c0_i32 = arith.constant 0 : i32
    return %arg0, %arg2 : i32, i32
  }
  func.func @transform_1(%arg0: i32, %arg1: i32, %arg2: i32) -> (i32, i32) {
    %c0_i32 = arith.constant 0 : i32
    return %arg1, %arg2 : i32, i32
  }
  func.func @transform_2(%arg0: i32, %arg1: i32, %arg2: i32) -> (i32, i32) {
    %c0_i32 = arith.constant 0 : i32
    %c0_i32_0 = arith.constant 0 : i32
    return %c0_i32, %arg1 : i32, i32
  }
  func.func @transform_3(%arg0: i32, %arg1: i32, %arg2: i32) -> (i32, i32) {
    %c0_i32 = arith.constant 0 : i32
    return %arg0, %arg1 : i32, i32
  }
}

</mosaic_0001>

<bundles_post_ra>
// kernel: tpu_custom_call.1
= control target key start
LH: loop header
LB: loop body
LE: loop exit
PB: predicated region body
PF: predicated region fallthrough
CT: control target
= control target key end

     0   :  { %8 = vsyncpa [#allocation4], 0  ;;  %s388_s0 = inlined_call_operand.hbm [shape: f32[16,32], index: 0, kind: input, shape index: {}]   ;;  %s389_s1 = inlined_call_operand.hbm [shape: f32[32,32], index: 1, kind: input, shape index: {}]   ;;  %s390_s2 = inlined_call_operand.vmem [shape: f32[1,32], index: 2, kind: input, shape index: {}]   ;;  %s391_s3 = inlined_call_operand.hbm [shape: f32[16,32], index: 3, kind: output, shape index: {}]  }
   0x1   :  { %9 = vsyncpa [#allocation7], 0 }
   0x2   :  { %10 = vsyncpa [#allocation5], 0  ;;  %s304_s12 = smov [#allocation3]   ;;  %s232_s16 = scalar_lea.hbm %s388_s0, 256 }
   0x3   :  { %s16_s13 = sshll.u32 %s304_s12, 4  ;;  %p233_p0 = scmp.ne.s32.totalorder %s388_s0, %s232_s16  ;;  %s17_s13 = int_to_ptr.vmem [resolvable:$true] %s16_s13 }
   0x4   :  { %p236_p1 = scmp.lt.u32.totalorder %s232_s16, %s388_s0 }
   0x6   :  { %p238_p2 = pnand %p236_p1, %p233_p0 }
   0x8   :  { %241 = shalt.err (!%p238_p2)
}
   0x9   :  { %s242_s21 = scalar_lea.vmem %s17_s13, 256  ;;  %p247_p4 = scmp.lt.s32.totalorder %s17_s13, %s17_s13 }
   0xa   :  { %p243_p3 = scmp.ne.s32.totalorder %s17_s13, %s242_s21  ;;  %p248_p5 = scmp.lt.s32.totalorder %s242_s21, %s242_s21 }
   0xc   :  { %p249_p6 = por %p248_p5, %p247_p4 }
   0xe   :  { %p250_p7 = pnand %p249_p6, %p243_p3 }
  0x10   :  { %253 = shalt.err (!%p250_p7)
}
  0x11   :  { %s305_s22 = smov 128   ;;  %s306_s23 = smov 8  }
  0x12   :  { %22 = dma.hbm_to_vmem [thread:$0]  %s388_s0, 256, %s17_s13, [#allocation4], %s305_s22, %s305_s22, %s306_s23  }
  0x13   :  { %s307_s26 = smov [#allocation6]   ;;  %s254_s30 = scalar_lea.hbm %s389_s1, 512 }
  0x14   :  { %s28_s27 = sshll.u32 %s307_s26, 4  ;;  %p255_p8 = scmp.ne.s32.totalorder %s389_s1, %s254_s30  ;;  %s29_s27 = int_to_ptr.vmem [resolvable:$true] %s28_s27 }
  0x15   :  { %p258_p9 = scmp.lt.u32.totalorder %s254_s30, %s389_s1 }
  0x17   :  { %p260_p10 = pnand %p258_p9, %p255_p8 }
  0x19   :  { %263 = shalt.err (!%p260_p10)
}
  0x1a   :  { %s264_s8 = scalar_lea.vmem %s29_s27, 512  ;;  %p269_p12 = scmp.lt.s32.totalorder %s29_s27, %s29_s27 }
  0x1b   :  { %p265_p11 = scmp.ne.s32.totalorder %s29_s27, %s264_s8  ;;  %p270_p13 = scmp.lt.s32.totalorder %s264_s8, %s264_s8 }
  0x1d   :  { %p271_p0 = por %p270_p13, %p269_p12 }
  0x1f   :  { %p272_p1 = pnand %p271_p0, %p265_p11 }
  0x21   :  { %275 = shalt.err (!%p272_p1)
}
  0x22   :  { %34 = dma.hbm_to_vmem [thread:$0]  %s389_s1, 512, %s29_s27, [#allocation7], %s305_s22, %s305_s22, %s306_s23  }
  0x23   :  { %298 = dma.done.wait [#allocation4], 256  }
  0x24   :  { %299 = vsyncadd [#allocation4], 4294967040 }
  0x25   :  { %300 = dma.done.wait [#allocation7], 512  }
  0x26   :  { %301 = vsyncadd [#allocation7], 4294966784  ;;  %vm47_vm0 = vcmask 261120   ;;  %v308_v0 = vmov 0.0   ;;  %v54_v1 = vld [vmem:[#allocation6] sm:$0xff]  ;;  %v55_v2 = vld [vmem:[#allocation6 + $0x8] sm:$0xff] }
  0x27   :  { %49 = vst.msk [vmem:[#allocation2 + $0x8] sm:$0xff] %vm47_vm0, %v308_v0  ;;  %48 = vst.msk [vmem:[#allocation2] sm:$0xff] %vm47_vm0, %v308_v0  ;;  %v56_v3 = vld [vmem:[#allocation6 + $0x10] sm:$0xff]  ;;  %v214_v4 = vpack.c.bf16 %v55_v2, %v54_v1  ;;  %v57_v5 = vld [vmem:[#allocation6 + $0x18] sm:$0xff]  ;;  %s309_s11 = smov [#allocation8]  }
  0x28   :  { %vm215_vm1 = vmpackc.low %vm47_vm0, %vm47_vm0  ;;  %v52_v6 = vld [vmem:[#allocation3] sm:$0xff]  ;;  %v220_v7 = vpack.c.bf16 %v57_v5, %v56_v3  ;;  %v53_v8 = vld [vmem:[#allocation3 + $0x8] sm:$0xff]  ;;  %s177_s12 = sshll.u32 %s309_s11, 4  ;;  %s178_s12 = int_to_ptr.vmem [resolvable:$true] %s177_s12 }
  0x29   :  { %211 = vmatprep.mubr.msk.f32.mxu0 %vm47_vm0, %v52_v6  ;;  %216 = vmatprep.subr.msk.bf16.mxu0 %vm215_vm1, %v214_v4  ;;  %v196_v15 = vld [vmem:[%s390_s2] ss:$0 sm:$0xff]  ;;  %s276_s13 = scalar_lea.vmem %s178_s12, 256  ;;  %p281_p3 = scmp.lt.s32.totalorder %s178_s12, %s178_s12 }
  0x2a   :  { %219 = vmatpush3.bf16.xpose.msk.msra.mxu0 %vm215_vm1, %v214_v4  ;;  %p277_p2 = scmp.ne.s32.totalorder %s178_s12, %s276_s13  ;;  %p282_p4 = scmp.lt.s32.totalorder %s276_s13, %s276_s13 }
  0x2b   :  { %222 = vmatprep.subr.msk.bf16.mxu0 %vm215_vm1, %v220_v7 }
  0x2c   :  { %p283_p5 = por %p282_p4, %p281_p3 }
  0x2e   :  { %v51_v9 = vld [vmem:[#allocation2 + $0x8] sm:$0xff]  ;;  %v50_v10 = vld [vmem:[#allocation2] sm:$0xff]  ;;  %p284_p6 = pnand %p283_p5, %p277_p2 }
  0x32   :  { %225 = vmatpush3.bf16.xpose.msk.msra.mxu0 %vm215_vm1, %v220_v7 }
  0x39   :  { %212 = vmatmul.mubr.msk.f32.vlgmr.msra.gmra.mrb[0].mxu0 %vm47_vm0, %v53_v8 }
 0x10c   :  { %v213_v11 = vpop.f32.mrb[0].mxu0 }
 0x10d   :  { %v153_v12 = vadd.f32 %v213_v11, %v51_v9  ;;  %v143_v13 = vpop.f32.mrb[1].mxu0 }
 0x10e   :  { %v152_v14 = vadd.f32 %v143_v13, %v50_v10 }
 0x10f   :  { %155 = vst.msk [vmem:[#allocation2 + $0x8] sm:$0xff] %vm47_vm0, %v153_v12 }
 0x110   :  { %154 = vst.msk [vmem:[#allocation2] sm:$0xff] %vm47_vm0, %v152_v14 }
 0x116   :  { %v160_v16 = vld [vmem:[#allocation2 + $0x8] sm:$0xff] }
 0x117   :  { %v159_v17 = vld [vmem:[#allocation2] sm:$0xff]  ;;  %v169_v18 = vadd.f32 %v196_v15, %v160_v16 }
 0x118   :  { %v168_v19 = vadd.f32 %v196_v15, %v159_v17 }
 0x119   :  { %171 = vst.msk [vmem:[#allocation8 + $0x8] sm:$0xff] %vm47_vm0, %v169_v18 }
 0x11a   :  { %170 = vst.msk [vmem:[#allocation8] sm:$0xff] %vm47_vm0, %v168_v19 }
 0x11b   :  { %287 = shalt.err (!%p284_p6)
}
 0x11c   :  { %s288_s15 = scalar_lea.hbm %s391_s3, 256 }
 0x11d   :  { %p289_p7 = scmp.ne.s32.totalorder %s391_s3, %s288_s15  ;;  %p292_p8 = scmp.lt.u32.totalorder %s288_s15, %s391_s3 }
 0x11f   :  { %p294_p9 = pnand %p292_p8, %p289_p7 }
 0x121   :  { %297 = shalt.err (!%p294_p9)
}
 0x122   :  { %183 = dma.vmem_to_hbm [thread:$0]  %s178_s12, 256, %s391_s3, [#allocation5], %s305_s22, %s305_s22, %s306_s23  }
 0x123   :  { %302 = dma.done.wait [#allocation5], 256  }
 0x124   :  { %303 = vsyncadd [#allocation5], 4294967040 }
 0x125   :  { %187 = vsyncpa [#allocation4], 1 }
 0x126   :  { %188 = vsyncpa [#allocation7], 1 }
 0x127   :  { %189 = vsyncpa [#allocation5], 1 }

</bundles_post_ra>
